<compile_context>
chip_gen: v5e
topology: v5e:2x2
jax: 0.10.0
libtpu: 0.0.40
codegen_flags: <defaults>
</compile_context>

<pallas_src>
import functools

import jax
import jax.numpy as jnp
from jax.experimental import pallas as pl
from jax.experimental.pallas import tpu as pltpu

_VMEM_LIMIT = 32 * 1024 * 1024  # safe scoped-VMEM request on v5e/v6e/v7x


def _pick_pixel_tile(total, cap=2048):
    """Largest pixel-tile dividing `total`, preferring multiples of 128 (lanes)."""
    if total <= cap:
        return total
    for t in range(cap, 127, -1):
        if total % t == 0 and t % 128 == 0:
            return t
    for t in range(cap, 0, -1):
        if total % t == 0:
            return t
    return total


# --------------------------------------------------------------------------
# Kernels
# --------------------------------------------------------------------------
def dw_conv_stats_kernel(xp_ref, w_ref, b_ref, y_ref, sum_ref, sq_ref, *,
                         K, Ho, Wo, stride):
    """Depthwise conv + bias for one sample, with fused BN1 partial statistics.

    Layout is channels-major (C, H, W). Emitting the per-channel sum / sumsq
    here removes the separate stats pass that re-read y1 from HBM.
    """
    xv = xp_ref[0].astype(jnp.float32)           # (C, Hp, Wp)
    wv = w_ref[...].astype(jnp.float32)          # (C, K, K)
    bv = b_ref[...].astype(jnp.float32)          # (C, 1, 1)
    C = xv.shape[0]

    span_h = (Ho - 1) * stride + 1
    span_w = (Wo - 1) * stride + 1
    acc = jnp.zeros((C, Ho, Wo), jnp.float32)
    for kh in range(K):                          # static unrolled taps (VPU FMAs)
        for kw in range(K):
            if stride == 1:
                patch = xv[:, kh:kh + Ho, kw:kw + Wo]           # contiguous
            else:
                patch = xv[:, kh:kh + span_h:stride, kw:kw + span_w:stride]
            acc = acc + patch * wv[:, kh:kh + 1, kw:kw + 1]

    y = acc + bv                                  # (C, Ho, Wo)
    y_ref[0] = y.astype(y_ref.dtype)
    # fused BN1 partial statistics (per-sample, per-channel)
    sum_ref[0] = jnp.sum(jnp.sum(y, axis=2), axis=1, keepdims=True)      # (C, 1)
    sq_ref[0] = jnp.sum(jnp.sum(y * y, axis=2), axis=1, keepdims=True)   # (C, 1)


def bn_relu_pw_stats_kernel(y_ref, s1_ref, t1_ref, wp_ref, bp_ref,
                            z_ref, sum_ref, sq_ref, *, c_in, use_mxu):
    """Fused BN1 + ReLU + 1x1 pointwise conv + bias, with fused BN2 partials.

    Tiles are (C, pix) / (Co, pix): flattened spatial pixels sit on the lane
    axis, so loads/stores are lane-dense. BN2 statistics accumulate across the
    inner ("arbitrary") pixel-block grid axis.
    """
    pb = pl.program_id(1)

    @pl.when(pb == 0)
    def _():
        sum_ref[...] = jnp.zeros_like(sum_ref)
        sq_ref[...] = jnp.zeros_like(sq_ref)

    y = y_ref[0].astype(jnp.float32)              # (C, tp)
    a = jnp.maximum(y * s1_ref[...] + t1_ref[...], 0.0)
    w = wp_ref[...].astype(jnp.float32)           # (Co, C)

    if use_mxu:
        # Larger channel counts: bf16 operands, f32 accumulation on the MXU.
        z = jnp.dot(w.astype(jnp.bfloat16), a.astype(jnp.bfloat16),
                    preferred_element_type=jnp.float32)
    else:
        # Tiny C/Co: a (Co,C)x(C,tp) matmul leaves the MXU almost idle —
        # C broadcast FMAs on the VPU are strictly faster.
        z = jnp.zeros((w.shape[0], a.shape[1]), jnp.float32)
        for c in range(c_in):
            z = z + w[:, c:c + 1] * a[c:c + 1, :]

    z = z + bp_ref[...]                           # (Co, tp) + (Co, 1)
    z_ref[0] = z.astype(z_ref.dtype)
    sum_ref[0] += jnp.sum(z, axis=1, keepdims=True)      # (Co, 1)
    sq_ref[0] += jnp.sum(z * z, axis=1, keepdims=True)   # (Co, 1)


def bn_relu_kernel(z_ref, s_ref, t_ref, o_ref):
    """Fused BN2 + ReLU on lane-dense (Co, pix) tiles."""
    zv = z_ref[0].astype(jnp.float32)
    o_ref[0] = jnp.maximum(zv * s_ref[...] + t_ref[...], 0.0).astype(o_ref.dtype)


# --------------------------------------------------------------------------
# Host-side glue
# --------------------------------------------------------------------------
def _fold_bn(sum_nc1, sq_nc1, gamma, beta, count, eps):
    """Reduce per-sample partials and fold BN into per-channel scale/shift."""
    s = jnp.sum(sum_nc1, axis=0)[:, 0]
    q = jnp.sum(sq_nc1, axis=0)[:, 0]
    mean = s / count
    var = jnp.maximum(q / count - mean * mean, 0.0)   # guard E[x^2]-m^2 cancellation
    inv = gamma / jnp.sqrt(var + eps)
    scale = inv.reshape(-1, 1)
    shift = (beta - mean * inv).reshape(-1, 1)
    return scale, shift


def depthwise_conv2d_forward(x_nchw, params, *, ksize, stride, padding, eps=1e-5):
    (w_dw, b_dw, g1, be1, w_pw, b_pw, g2, be2) = params
    N, C, H, W = x_nchw.shape
    Co = w_pw.shape[1]

    x = x_nchw.astype(jnp.float32)
    xp = jnp.pad(x, ((0, 0), (0, 0), (padding, padding), (padding, padding)))
    Hp, Wp = H + 2 * padding, W + 2 * padding
    Ho = (Hp - ksize) // stride + 1
    Wo = (Wp - ksize) // stride + 1
    HoWo = Ho * Wo

    # parameter-sized re-layouts (negligible)
    w_dw_ckk = jnp.transpose(w_dw, (2, 0, 1))          # (C, K, K)
    b_dw_c = b_dw.reshape(C, 1, 1)

    # --- depthwise conv + bias + fused BN1 partial stats (per-sample grid) ---
    # NOTE: whole-sample spatial blocks are fine at these shapes; production
    # MobileNet-scale images would add a row-tiled grid axis with a K-1 halo.
    y1, s1, q1 = pl.pallas_call(
        functools.partial(dw_conv_stats_kernel, K=ksize, Ho=Ho, Wo=Wo,
                          stride=stride),
        out_shape=(jax.ShapeDtypeStruct((N, C, Ho, Wo), jnp.float32),
                   jax.ShapeDtypeStruct((N, C, 1), jnp.float32),
                   jax.ShapeDtypeStruct((N, C, 1), jnp.float32)),
        grid=(N,),
        in_specs=[pl.BlockSpec((1, C, Hp, Wp), lambda n: (n, 0, 0, 0)),
                  pl.BlockSpec((C, ksize, ksize), lambda n: (0, 0, 0)),
                  pl.BlockSpec((C, 1, 1), lambda n: (0, 0, 0))],
        out_specs=(pl.BlockSpec((1, C, Ho, Wo), lambda n: (n, 0, 0, 0)),
                   pl.BlockSpec((1, C, 1), lambda n: (n, 0, 0)),
                   pl.BlockSpec((1, C, 1), lambda n: (n, 0, 0))),
        compiler_params=pltpu.CompilerParams(
            dimension_semantics=("parallel",), vmem_limit_bytes=_VMEM_LIMIT),
    )(xp, w_dw_ckk, b_dw_c)

    scale1, shift1 = _fold_bn(s1, q1, g1, be1, float(N * HoWo), eps)

    # flatten spatial (free row-major reshape) -> lane-dense (C, Ho*Wo) tiles
    y1f = y1.reshape(N, C, HoWo)

    tp = _pick_pixel_tile(HoWo)
    npb = HoWo // tp
    use_mxu = C > 32

    # --- fused BN1 + ReLU + 1x1 pointwise + bias + fused BN2 partial stats ---
    z, s2, q2 = pl.pallas_call(
        functools.partial(bn_relu_pw_stats_kernel, c_in=C, use_mxu=use_mxu),
        out_shape=(jax.ShapeDtypeStruct((N, Co, HoWo), jnp.float32),
                   jax.ShapeDtypeStruct((N, Co, 1), jnp.float32),
                   jax.ShapeDtypeStruct((N, Co, 1), jnp.float32)),
        grid=(N, npb),
        in_specs=[pl.BlockSpec((1, C, tp), lambda n, p: (n, 0, p)),
                  pl.BlockSpec((C, 1), lambda n, p: (0, 0)),
                  pl.BlockSpec((C, 1), lambda n, p: (0, 0)),
                  pl.BlockSpec((Co, C), lambda n, p: (0, 0)),
                  pl.BlockSpec((Co, 1), lambda n, p: (0, 0))],
        out_specs=(pl.BlockSpec((1, Co, tp), lambda n, p: (n, 0, p)),
                   pl.BlockSpec((1, Co, 1), lambda n, p: (n, 0, 0)),
                   pl.BlockSpec((1, Co, 1), lambda n, p: (n, 0, 0))),
        compiler_params=pltpu.CompilerParams(
            dimension_semantics=("parallel", "arbitrary"),
            vmem_limit_bytes=_VMEM_LIMIT),
    )(y1f, scale1, shift1, jnp.transpose(w_pw), b_pw.reshape(Co, 1))

    scale2, shift2 = _fold_bn(s2, q2, g2, be2, float(N * HoWo), eps)

    # --- fused BN2 + ReLU (lane-dense elementwise) ---
    out_flat = pl.pallas_call(
        bn_relu_kernel,
        out_shape=jax.ShapeDtypeStruct((N, Co, HoWo), jnp.float32),
        grid=(N, npb),
        in_specs=[pl.BlockSpec((1, Co, tp), lambda n, p: (n, 0, p)),
                  pl.BlockSpec((Co, 1), lambda n, p: (0, 0)),
                  pl.BlockSpec((Co, 1), lambda n, p: (0, 0))],
        out_specs=pl.BlockSpec((1, Co, tp), lambda n, p: (n, 0, p)),
        compiler_params=pltpu.CompilerParams(
            dimension_semantics=("parallel", "parallel"),
            vmem_limit_bytes=_VMEM_LIMIT),
    )(z, scale2, shift2)

    # result is already NCHW — only un-flatten spatial (free), no transpose
    return out_flat.reshape(N, Co, Ho, Wo)


# --------------------------------------------------------------------------
# Pure-JAX reference (same training-mode BN semantics) for a sanity check
# --------------------------------------------------------------------------
def reference_forward(x_nchw, params, *, ksize, stride, padding, eps=1e-5):
    (w_dw, b_dw, g1, be1, w_pw, b_pw, g2, be2) = params
    C = x_nchw.shape[1]

    def bn_train(v, g, b):
        m = jnp.mean(v, axis=(0, 2, 3), keepdims=True)
        var = jnp.mean((v - m) ** 2, axis=(0, 2, 3), keepdims=True)
        return (v - m) / jnp.sqrt(var + eps) * g[None, :, None, None] + b[None, :, None, None]

    w_dw_oihw = jnp.transpose(w_dw, (2, 0, 1))[:, None, :, :]     # (C,1,k,k)
    y = jax.lax.conv_general_dilated(
        x_nchw, w_dw_oihw, (stride, stride),
        [(padding, padding), (padding, padding)],
        feature_group_count=C,
        dimension_numbers=("NCHW", "OIHW", "NCHW")) + b_dw[None, :, None, None]
    y = jax.nn.relu(bn_train(y, g1, be1))

    w_pw_oihw = jnp.transpose(w_pw, (1, 0))[:, :, None, None]     # (Co,C,1,1)
    z = jax.lax.conv_general_dilated(
        y, w_pw_oihw, (1, 1), [(0, 0), (0, 0)],
        dimension_numbers=("NCHW", "OIHW", "NCHW")) + b_pw[None, :, None, None]
    return jax.nn.relu(bn_train(z, g2, be2))


# --------------------------------------------------------------------------
if __name__ == "__main__":
    N, C, H, W = 2, 4, 16, 16
    Co, K, PAD, STRIDE = 8, 3, 1, 1

    key = jax.random.PRNGKey(0)
    k_x, k_wdw, k_bdw, k_wpw, k_bpw = jax.random.split(key, 5)

    x = jax.random.normal(k_x, (N, C, H, W), jnp.float32)

    # Deterministic synthetic parameters (PyTorch-shaped, re-laid-out channel-last).
    w_dw = jax.random.normal(k_wdw, (K, K, C), jnp.float32) * 0.2   # depthwise (k,k,C)
    b_dw = jax.random.normal(k_bdw, (C,), jnp.float32) * 0.1
    g1 = jnp.ones((C,), jnp.float32)                                 # BatchNorm2d init
    be1 = jnp.zeros((C,), jnp.float32)
    w_pw = jax.random.normal(k_wpw, (C, Co), jnp.float32) * 0.2     # 1x1 conv (C_in, C_out)
    b_pw = jax.random.normal(k_bpw, (Co,), jnp.float32) * 0.1
    g2 = jnp.ones((Co,), jnp.float32)
    be2 = jnp.zeros((Co,), jnp.float32)

    params = (w_dw, b_dw, g1, be1, w_pw, b_pw, g2, be2)

    out = depthwise_conv2d_forward(x, params, ksize=K, stride=STRIDE, padding=PAD)
    out = jax.block_until_ready(out)

    ref = reference_forward(x, params, ksize=K, stride=STRIDE, padding=PAD)
    ref = jax.block_until_ready(ref)

    assert out.shape == (N, Co, H, W), out.shape
    assert jnp.allclose(out, ref, atol=2e-3, rtol=2e-3), float(jnp.max(jnp.abs(out - ref)))

    print("KERNEL_OK")
</pallas_src>

<mosaic_0001>
module attributes {stable_mosaic.version = 11 : i64} {
  func.func @dw_conv_stats_kernel(%arg0: i32, %arg1: memref<1x4x18x18xf32, #tpu.memory_space<vmem>>, %arg2: memref<4x3x3xf32, #tpu.memory_space<vmem>>, %arg3: memref<4x1x1xf32, #tpu.memory_space<vmem>>, %arg4: memref<1x4x16x16xf32, #tpu.memory_space<vmem>>, %arg5: memref<1x4x1xf32, #tpu.memory_space<vmem>>, %arg6: memref<1x4x1xf32, #tpu.memory_space<vmem>>) attributes {dimension_semantics = [#tpu.dimension_semantics<parallel>], iteration_bounds = array<i64: 2>, scalar_prefetch = 0 : i64, scratch_operands = 0 : i64, tpu.core_type = #tpu.core_type<tc>, window_params = [{transform_indices = @transform_0, window_bounds = array<i64: 1, 4, 18, 18>}, {pipeline_mode = #tpu.pipeline_mode<synchronous>, transform_indices = @transform_1, window_bounds = array<i64: 4, 3, 3>}, {pipeline_mode = #tpu.pipeline_mode<synchronous>, transform_indices = @transform_2, window_bounds = array<i64: 4, 1, 1>}, {transform_indices = @transform_3, window_bounds = array<i64: 1, 4, 16, 16>}, {transform_indices = @transform_4, window_bounds = array<i64: 1, 4, 1>}, {transform_indices = @transform_5, window_bounds = array<i64: 1, 4, 1>}]} {
    %c0 = arith.constant 0 : index
    %c0_0 = arith.constant 0 : index
    %c0_1 = arith.constant 0 : index
    %c0_2 = arith.constant 0 : index
    %0 = vector.load %arg1[%c0, %c0_0, %c0_1, %c0_2] : memref<1x4x18x18xf32, #tpu.memory_space<vmem>>, vector<1x4x18x18xf32>
    %1 = vector.shape_cast %0 : vector<1x4x18x18xf32> to vector<4x18x18xf32>
    %c0_3 = arith.constant 0 : index
    %c0_4 = arith.constant 0 : index
    %c0_5 = arith.constant 0 : index
    %2 = vector.load %arg2[%c0_3, %c0_4, %c0_5] : memref<4x3x3xf32, #tpu.memory_space<vmem>>, vector<4x3x3xf32>
    %c0_6 = arith.constant 0 : index
    %c0_7 = arith.constant 0 : index
    %c0_8 = arith.constant 0 : index
    %3 = vector.load %arg3[%c0_6, %c0_7, %c0_8] : memref<4x1x1xf32, #tpu.memory_space<vmem>>, vector<4x1x1xf32>
    %cst = arith.constant 0.000000e+00 : f32
    %4 = vector.broadcast %cst : f32 to vector<4x16x16xf32>
    %5 = vector.extract_strided_slice %1 {offsets = [0, 0, 0], sizes = [4, 16, 16], strides = [1, 1, 1]} : vector<4x18x18xf32> to vector<4x16x16xf32>
    %6 = vector.extract_strided_slice %2 {offsets = [0, 0, 0], sizes = [4, 1, 1], strides = [1, 1, 1]} : vector<4x3x3xf32> to vector<4x1x1xf32>
    %7 = vector.broadcast %6 : vector<4x1x1xf32> to vector<4x16x16xf32>
    %8 = arith.mulf %5, %7 : vector<4x16x16xf32>
    %9 = arith.addf %4, %8 : vector<4x16x16xf32>
    %10 = vector.extract_strided_slice %1 {offsets = [0, 0, 1], sizes = [4, 16, 16], strides = [1, 1, 1]} : vector<4x18x18xf32> to vector<4x16x16xf32>
    %11 = vector.extract_strided_slice %2 {offsets = [0, 0, 1], sizes = [4, 1, 1], strides = [1, 1, 1]} : vector<4x3x3xf32> to vector<4x1x1xf32>
    %12 = vector.broadcast %11 : vector<4x1x1xf32> to vector<4x16x16xf32>
    %13 = arith.mulf %10, %12 : vector<4x16x16xf32>
    %14 = arith.addf %9, %13 : vector<4x16x16xf32>
    %15 = vector.extract_strided_slice %1 {offsets = [0, 0, 2], sizes = [4, 16, 16], strides = [1, 1, 1]} : vector<4x18x18xf32> to vector<4x16x16xf32>
    %16 = vector.extract_strided_slice %2 {offsets = [0, 0, 2], sizes = [4, 1, 1], strides = [1, 1, 1]} : vector<4x3x3xf32> to vector<4x1x1xf32>
    %17 = vector.broadcast %16 : vector<4x1x1xf32> to vector<4x16x16xf32>
    %18 = arith.mulf %15, %17 : vector<4x16x16xf32>
    %19 = arith.addf %14, %18 : vector<4x16x16xf32>
    %20 = vector.extract_strided_slice %1 {offsets = [0, 1, 0], sizes = [4, 16, 16], strides = [1, 1, 1]} : vector<4x18x18xf32> to vector<4x16x16xf32>
    %21 = vector.extract_strided_slice %2 {offsets = [0, 1, 0], sizes = [4, 1, 1], strides = [1, 1, 1]} : vector<4x3x3xf32> to vector<4x1x1xf32>
    %22 = vector.broadcast %21 : vector<4x1x1xf32> to vector<4x16x16xf32>
    %23 = arith.mulf %20, %22 : vector<4x16x16xf32>
    %24 = arith.addf %19, %23 : vector<4x16x16xf32>
    %25 = vector.extract_strided_slice %1 {offsets = [0, 1, 1], sizes = [4, 16, 16], strides = [1, 1, 1]} : vector<4x18x18xf32> to vector<4x16x16xf32>
    %26 = vector.extract_strided_slice %2 {offsets = [0, 1, 1], sizes = [4, 1, 1], strides = [1, 1, 1]} : vector<4x3x3xf32> to vector<4x1x1xf32>
    %27 = vector.broadcast %26 : vector<4x1x1xf32> to vector<4x16x16xf32>
    %28 = arith.mulf %25, %27 : vector<4x16x16xf32>
    %29 = arith.addf %24, %28 : vector<4x16x16xf32>
    %30 = vector.extract_strided_slice %1 {offsets = [0, 1, 2], sizes = [4, 16, 16], strides = [1, 1, 1]} : vector<4x18x18xf32> to vector<4x16x16xf32>
    %31 = vector.extract_strided_slice %2 {offsets = [0, 1, 2], sizes = [4, 1, 1], strides = [1, 1, 1]} : vector<4x3x3xf32> to vector<4x1x1xf32>
    %32 = vector.broadcast %31 : vector<4x1x1xf32> to vector<4x16x16xf32>
    %33 = arith.mulf %30, %32 : vector<4x16x16xf32>
    %34 = arith.addf %29, %33 : vector<4x16x16xf32>
    %35 = vector.extract_strided_slice %1 {offsets = [0, 2, 0], sizes = [4, 16, 16], strides = [1, 1, 1]} : vector<4x18x18xf32> to vector<4x16x16xf32>
    %36 = vector.extract_strided_slice %2 {offsets = [0, 2, 0], sizes = [4, 1, 1], strides = [1, 1, 1]} : vector<4x3x3xf32> to vector<4x1x1xf32>
    %37 = vector.broadcast %36 : vector<4x1x1xf32> to vector<4x16x16xf32>
    %38 = arith.mulf %35, %37 : vector<4x16x16xf32>
    %39 = arith.addf %34, %38 : vector<4x16x16xf32>
    %40 = vector.extract_strided_slice %1 {offsets = [0, 2, 1], sizes = [4, 16, 16], strides = [1, 1, 1]} : vector<4x18x18xf32> to vector<4x16x16xf32>
    %41 = vector.extract_strided_slice %2 {offsets = [0, 2, 1], sizes = [4, 1, 1], strides = [1, 1, 1]} : vector<4x3x3xf32> to vector<4x1x1xf32>
    %42 = vector.broadcast %41 : vector<4x1x1xf32> to vector<4x16x16xf32>
    %43 = arith.mulf %40, %42 : vector<4x16x16xf32>
    %44 = arith.addf %39, %43 : vector<4x16x16xf32>
    %45 = vector.extract_strided_slice %1 {offsets = [0, 2, 2], sizes = [4, 16, 16], strides = [1, 1, 1]} : vector<4x18x18xf32> to vector<4x16x16xf32>
    %46 = vector.extract_strided_slice %2 {offsets = [0, 2, 2], sizes = [4, 1, 1], strides = [1, 1, 1]} : vector<4x3x3xf32> to vector<4x1x1xf32>
    %47 = vector.broadcast %46 : vector<4x1x1xf32> to vector<4x16x16xf32>
    %48 = arith.mulf %45, %47 : vector<4x16x16xf32>
    %49 = arith.addf %44, %48 : vector<4x16x16xf32>
    %50 = vector.broadcast %3 : vector<4x1x1xf32> to vector<4x16x16xf32>
    %51 = arith.addf %49, %50 : vector<4x16x16xf32>
    %c0_9 = arith.constant 0 : index
    %c0_10 = arith.constant 0 : index
    %c0_11 = arith.constant 0 : index
    %c0_12 = arith.constant 0 : index
    %52 = vector.load %arg4[%c0_9, %c0_10, %c0_11, %c0_12] : memref<1x4x16x16xf32, #tpu.memory_space<vmem>>, vector<1x4x16x16xf32>
    %53 = vector.shape_cast %52 : vector<1x4x16x16xf32> to vector<4x16x16xf32>
    %54 = vector.shape_cast %51 : vector<4x16x16xf32> to vector<1x4x16x16xf32>
    tpu.vector_store %arg4[%c0_9, %c0_10, %c0_11, %c0_12], %54 {strides = array<i32>} : memref<1x4x16x16xf32, #tpu.memory_space<vmem>>, vector<1x4x16x16xf32>,
    %cst_13 = arith.constant dense<0.000000e+00> : vector<4x16xf32>
    %55 = vector.multi_reduction <add>, %51, %cst_13 [2] : vector<4x16x16xf32> to vector<4x16xf32>
    %cst_14 = arith.constant dense<0.000000e+00> : vector<4xf32>
    %56 = vector.multi_reduction <add>, %55, %cst_14 [1] : vector<4x16xf32> to vector<4xf32>
    %57 = vector.shape_cast %56 : vector<4xf32> to vector<4x1xf32>
    %c0_15 = arith.constant 0 : index
    %c0_16 = arith.constant 0 : index
    %c0_17 = arith.constant 0 : index
    %58 = vector.load %arg5[%c0_15, %c0_16, %c0_17] : memref<1x4x1xf32, #tpu.memory_space<vmem>>, vector<1x4x1xf32>
    %59 = vector.shape_cast %58 : vector<1x4x1xf32> to vector<4x1xf32>
    %60 = vector.shape_cast %57 : vector<4x1xf32> to vector<1x4x1xf32>
    tpu.vector_store %arg5[%c0_15, %c0_16, %c0_17], %60 {strides = array<i32>} : memref<1x4x1xf32, #tpu.memory_space<vmem>>, vector<1x4x1xf32>,
    %61 = arith.mulf %51, %51 : vector<4x16x16xf32>
    %cst_18 = arith.constant dense<0.000000e+00> : vector<4x16xf32>
    %62 = vector.multi_reduction <add>, %61, %cst_18 [2] : vector<4x16x16xf32> to vector<4x16xf32>
    %cst_19 = arith.constant dense<0.000000e+00> : vector<4xf32>
    %63 = vector.multi_reduction <add>, %62, %cst_19 [1] : vector<4x16xf32> to vector<4xf32>
    %64 = vector.shape_cast %63 : vector<4xf32> to vector<4x1xf32>
    %c0_20 = arith.constant 0 : index
    %c0_21 = arith.constant 0 : index
    %c0_22 = arith.constant 0 : index
    %65 = vector.load %arg6[%c0_20, %c0_21, %c0_22] : memref<1x4x1xf32, #tpu.memory_space<vmem>>, vector<1x4x1xf32>
    %66 = vector.shape_cast %65 : vector<1x4x1xf32> to vector<4x1xf32>
    %67 = vector.shape_cast %64 : vector<4x1xf32> to vector<1x4x1xf32>
    tpu.vector_store %arg6[%c0_20, %c0_21, %c0_22], %67 {strides = array<i32>} : memref<1x4x1xf32, #tpu.memory_space<vmem>>, vector<1x4x1xf32>,
    return
  }
  func.func @transform_0(%arg0: i32) -> (i32, i32, i32, i32) {
    %c0_i32 = arith.constant 0 : i32
    %c0_i32_0 = arith.constant 0 : i32
    %c0_i32_1 = arith.constant 0 : i32
    %c0_i32_2 = arith.constant 0 : i32
    return %arg0, %c0_i32, %c0_i32_0, %c0_i32_1 : i32, i32, i32, i32
  }
  func.func @transform_1(%arg0: i32) -> (i32, i32, i32) {
    %c0_i32 = arith.constant 0 : i32
    %c0_i32_0 = arith.constant 0 : i32
    %c0_i32_1 = arith.constant 0 : i32
    %c0_i32_2 = arith.constant 0 : i32
    return %c0_i32, %c0_i32_0, %c0_i32_1 : i32, i32, i32
  }
  func.func @transform_2(%arg0: i32) -> (i32, i32, i32) {
    %c0_i32 = arith.constant 0 : i32
    %c0_i32_0 = arith.constant 0 : i32
    %c0_i32_1 = arith.constant 0 : i32
    %c0_i32_2 = arith.constant 0 : i32
    return %c0_i32, %c0_i32_0, %c0_i32_1 : i32, i32, i32
  }
  func.func @transform_3(%arg0: i32) -> (i32, i32, i32, i32) {
    %c0_i32 = arith.constant 0 : i32
    %c0_i32_0 = arith.constant 0 : i32
    %c0_i32_1 = arith.constant 0 : i32
    %c0_i32_2 = arith.constant 0 : i32
    return %arg0, %c0_i32, %c0_i32_0, %c0_i32_1 : i32, i32, i32, i32
  }
  func.func @transform_4(%arg0: i32) -> (i32, i32, i32) {
    %c0_i32 = arith.constant 0 : i32
    %c0_i32_0 = arith.constant 0 : i32
    %c0_i32_1 = arith.constant 0 : i32
    return %arg0, %c0_i32, %c0_i32_0 : i32, i32, i32
  }
  func.func @transform_5(%arg0: i32) -> (i32, i32, i32) {
    %c0_i32 = arith.constant 0 : i32
    %c0_i32_0 = arith.constant 0 : i32
    %c0_i32_1 = arith.constant 0 : i32
    return %arg0, %c0_i32, %c0_i32_0 : i32, i32, i32
  }
}

</mosaic_0001>

<bundles_post_ra>
// kernel: tpu_custom_call.1
= control target key start
LH: loop header
LB: loop body
LE: loop exit
PB: predicated region body
PF: predicated region fallthrough
CT: control target
= control target key end

     0   :  { %11 = vsyncpa [#allocation3], 0  ;;  %s2087_s0 = inlined_call_operand.vmem [shape: f32[2,4,18,18], index: 0, kind: input, shape index: {}]   ;;  %s2088_s1 = inlined_call_operand.vmem [shape: f32[4,3,3], index: 1, kind: input, shape index: {}]   ;;  %s2089_s2 = inlined_call_operand.vmem [shape: f32[4,1,1], index: 2, kind: input, shape index: {}]   ;;  %s2090_s3 = inlined_call_operand.hbm [shape: f32[2,4,16,16], index: 3, kind: output, shape index: {0}]   ;;  %s2091_s4 = inlined_call_operand.vmem [shape: f32[2,4,1], index: 4, kind: output, shape index: {1}]   ;;  %s2092_s5 = inlined_call_operand.vmem [shape: f32[2,4,1], index: 5, kind: output, shape index: {2}]  }
   0x1   :  { %13 = vsyncpa [#allocation3 + $0x1], 0  ;;  %s1509_s18 = smov 0   ;;  %s1511_s19 = smov 0  }
   0x2   :  { %s1513_s20 = smov 0   ;;  %s1515_s21 = smov 0  }
   0x3 LB: > { %s1530_s22 = sadd.s32 4294967295, %s1472_s21   ;;  %s1272_s23 = sadd.s32 4294967294, %s1472_s21   ;;  %s1472_s21 = sphi %s1515_s21, %s2098_s21   ;;  %s1468_s20 = sphi %s1513_s20, %s2097_s20   ;;  %s1464_s19 = sphi %s1511_s19, %s2096_s19   ;;  %s1460_s18 = sphi %s1509_s18, %s2095_s18  }
   0x4   : > { %s1534_s24 = sadd.s32 1, %s1472_s21   ;;  %s94_s25 = sadd.s32 1, %s1468_s20 }
   0x5   : > { %s91_s26 = ssub.s32 %s1472_s21, %s1534_s24  ;;  %p104_p0 = scmp.ne.s32.totalorder %s1468_s20, %s1464_s19 }
   0x6   : > { %p92_p1 = scmp.eq.s32.totalorder %s91_s26, 0  ;;  %p105_p2 = scmp.eq.s32.totalorder %s1530_s22, 1 }
   0x7   : > { %p110_p3 = scmp.ne.s32.totalorder %s1464_s19, %s1460_s18  ;;  %p111_p4 = scmp.eq.s32.totalorder %s1272_s23, 1 }
   0x8   : > { %s1545_s27 = scalar_select %p92_p1, %s1468_s20, %s94_s25  }
   0x9   : > { %p1547_p5 = por %p105_p2, %p104_p0  ;;  %p1551_p6 = por %p111_p4, %p110_p3 }
   0xa   : > { %p1275_p7 = scmp.ge.s32.totalorder %s1472_s21, 1  ;;  %p195_p8 = scmp.lt.s32.totalorder %s1472_s21, 3 }
   0xc   : > { %p196_p9 = pnand %p1275_p7, %p195_p8 }
   0xd   : > { %s1474_s9 = smov (!%p196_p9), 127   ;;  %s1475_s12 = smov (!%p196_p9), 126  }
   0xe   : > { %199 = sbr.rel (%p196_p9) target bundleno = 713 (0x2c9), region = 32  ;;  %p231_p10 = scmp.lt.s32.totalorder (!%p196_p9), %s1530_s22, 1 }
  0x13   : > { %v256_v0 = vld [vmem:[%s2088_s1] sm:$0x7]  ;;  %v258_v1 = vld [vmem:[%s2088_s1 + $0x8] sm:$0x7]  ;;  %v257_v2 = vld [vmem:[%s2088_s1 + $0x4] sm:$0x7] }
  0x14   : > { %296 = vrot.lane.b32.xlu0 %v256_v0, %s1474_s9  ;;  %300 = vrot.lane.b32.xlu1 %v258_v1, %s1474_s9  ;;  %1287 = vpush %v256_v0  ;;  %v259_v3 = vld [vmem:[%s2088_s1 + $0xc] sm:$0x7]  ;;  %v432_v4 = vrot.slane %v256_v0, 1  ;;  %v434_v6 = vrot.slane %v258_v1, 1  ;;  %v433_v7 = vrot.slane %v257_v2, 1  ;;  %v1581_v8 = vrot.slane %v257_v2, 2 }
  0x15   : > { %368 = vrot.lane.b32.xlu2 %v258_v1, %s1475_s12  ;;  %1289 = vpush %v257_v2  ;;  %v435_v5 = vrot.slane %v259_v3, 1  ;;  %v701_v9 = vrot.slane %v256_v0, 2  ;;  %v704_v10 = vrot.slane %v259_v3, 2  ;;  %v703_v11 = vrot.slane %v258_v1, 2  ;;  %s1599_s15 = scalar_select %p231_p10, %s1530_s22, 1 }
  0x16   : > { %1291 = vpush %v258_v1  ;;  %vm472_vm0 = vcmask 1046528   ;;  %vm741_vm1 = vcmask 1045504   ;;  %vm1002_vm2 = vcmask 130048   ;;  %vm1048_vm3 = vcmask 130112  }
  0x17   : > { %1293 = vpush %v259_v3  ;;  %s1286_s16 = smul.u32 96, %s1599_s15 }
  0x19   : > { %s1609_s30 = scalar_lea.vmem %s2087_s0, %s1286_s16 }
  0x1a   : > { %v1616_v28 = vld [vmem:[%s1609_s30] sm:$0xff]  ;;  %v1622_v34 = vld [vmem:[%s1609_s30 + $0x18] sm:$0xff]  ;;  %v1628_v36 = vld [vmem:[%s1609_s30 + $0x8] sm:$0xff] }
  0x1b   : > { %v1625_v35 = vld [vmem:[%s1609_s30 + $0x20] sm:$0xff]  ;;  %v1640_v43 = vld [vmem:[%s1609_s30 + $0x38] sm:$0xff]  ;;  %v1643_v44 = vld [vmem:[%s1609_s30 + $0x48] sm:$0xff] }
  0x1c   : > { %298 = vrot.lane.b32.xlu0 %v257_v2, %s1474_s9  ;;  %302 = vrot.lane.b32.xlu1 %v259_v3, %s1474_s9  ;;  %v1646_v46 = vld [vmem:[%s1609_s30 + $0x30] sm:$0xff]  ;;  %v1670_v57 = vld [vmem:[%s1609_s30 + $0x28] sm:$0x3] }
  0x1d   : > { %509 = vrot.lane.b32.xlu2 %v432_v4, %s1474_s9  ;;  %v1667_v56 = vld [vmem:[%s1609_s30 + $0x10] sm:$0x3] }
  0x1e   : > { %v1673_v58 = vld [vmem:[%s1609_s30 + $0x50] sm:$0xff] }
  0x24   : > { %366 = vrot.lane.b32.xlu1 %v257_v2, %s1475_s12  ;;  %364 = vrot.lane.b32.xlu0 %v256_v0, %s1475_s12  ;;  %v1685_v0 = vld [vmem:[%s1609_s30 + $0x40] sm:$0x3] }
  0x25   : > { %515 = vrot.lane.b32.xlu2 %v435_v5, %s1474_s9 }
  0x2c   : > { %370 = vrot.lane.b32.xlu0 %v259_v3, %s1475_s12  ;;  %513 = vrot.lane.b32.xlu1 %v434_v6, %s1474_s9  ;;  %v1690_v3 = vld [vmem:[%s1609_s30 + $0x58] sm:$0x3] }
  0x2d   : > { %609 = vrot.lane.b32.xlu2 %v434_v6, %s1475_s12 }
  0x34   : > { %511 = vrot.lane.b32.xlu0 %v433_v7, %s1474_s9  ;;  %607 = vrot.lane.b32.xlu1 %v433_v7, %s1475_s12 }
  0x35   : > { %780 = vrot.lane.b32.xlu2 %v1581_v8, %s1474_s9 }
  0x3c   : > { %605 = vrot.lane.b32.xlu0 %v432_v4, %s1475_s12  ;;  %778 = vrot.lane.b32.xlu1 %v701_v9, %s1474_s9 }
  0x3d   : > { %874 = vrot.lane.b32.xlu2 %v701_v9, %s1475_s12 }
  0x44   : > { %611 = vrot.lane.b32.xlu0 %v435_v5, %s1475_s12  ;;  %784 = vrot.lane.b32.xlu1 %v704_v10, %s1474_s9 }
  0x45   : > { %880 = vrot.lane.b32.xlu2 %v704_v10, %s1475_s12  ;;  %s1602_s17 = spop %1287 }
  0x46   : > { %s1604_s23 = spop %1289 }
  0x47   : > { %s1611_s6 = spop %1291 }
  0x48   : > { %s1613_s7 = spop %1293 }
  0x4c   : > { %782 = vrot.lane.b32.xlu0 %v703_v11, %s1474_s9  ;;  %878 = vrot.lane.b32.xlu1 %v703_v11, %s1475_s12 }
  0x54   : > { %876 = vrot.lane.b32.xlu0 %v1581_v8, %s1475_s12 }
  0x6f   : > { %v369_v16 = vpop.permute.xlu2 %368 }
  0x77   : > { %v510_v20 = vpop.permute.xlu2 %509 }
  0x7f   : > { %v516_v23 = vpop.permute.xlu2 %515 }
  0x86   : > { %v297_v12 = vpop.permute.xlu0 %296  ;;  %v301_v13 = vpop.permute.xlu1 %300 }
  0x87   : > { %1295 = vpush %v297_v12  ;;  %v610_v26 = vpop.permute.xlu2 %609 }
  0x8e   : > { %v299_v14 = vpop.permute.xlu0 %298  ;;  %v303_v15 = vpop.permute.xlu1 %302 }
  0x8f   : > { %1297 = vpush %v299_v14  ;;  %v781_v32 = vpop.permute.xlu2 %780 }
  0x90   : > { %1299 = vpush %v301_v13 }
  0x91   : > { %1301 = vpush %v303_v15 }
  0x96   : > { %v367_v17 = vpop.permute.xlu1 %366  ;;  %v365_v18 = vpop.permute.xlu0 %364 }
  0x97   : > { %1303 = vpush %v365_v18  ;;  %v875_v53 = vpop.permute.xlu2 %874 }
  0x98   : > { %1305 = vpush %v367_v17 }
  0x99   : > { %1307 = vpush %v369_v16 }
  0x9e   : > { %v371_v19 = vpop.permute.xlu0 %370  ;;  %v514_v21 = vpop.permute.xlu1 %513 }
  0x9f   : > { %1309 = vpush %v371_v19  ;;  %v881_v14 = vpop.permute.xlu2 %880 }
  0xa0   : > { %1311 = vpush %v432_v4 }
  0xa1   : > { %1313 = vpush %v433_v7 }
  0xa2   : > { %1315 = vpush %v434_v6 }
  0xa3   : > { %1317 = vpush %v435_v5 }
  0xa4   : > { %1319 = vpush %v510_v20 }
  0xa6   : > { %v512_v22 = vpop.permute.xlu0 %511  ;;  %v608_v24 = vpop.permute.xlu1 %607 }
  0xa7   : > { %1321 = vpush %v512_v22 }
  0xa8   : > { %1323 = vpush %v514_v21 }
  0xa9   : > { %1325 = vpush %v516_v23 }
  0xae   : > { %v606_v25 = vpop.permute.xlu0 %605  ;;  %v779_v30 = vpop.permute.xlu1 %778 }
  0xaf   : > { %1327 = vpush %v606_v25 }
  0xb0   : > { %1329 = vpush %v608_v24 }
  0xb1   : > { %1331 = vpush %v610_v26 }
  0xb6   : > { %v612_v27 = vpop.permute.xlu0 %611  ;;  %v785_v42 = vpop.permute.xlu1 %784 }
  0xb7   : > { %1333 = vpush %v612_v27 }
  0xb8   : > { %s1296_s8 = spop %1295  ;;  %1335 = vpush %v701_v9 }
  0xb9   : > { %v305_v29 = vstv %s1296_s8  ;;  %1337 = vpush %v1581_v8 }
  0xba   : > { %v316_v31 = vmul.f32 %v305_v29, %v1616_v28  ;;  %1339 = vpush %v703_v11  ;;  %v317_v40 = vmul.f32 %v305_v29, %v1628_v36 }
  0xbb   : > { %1341 = vpush %v704_v10 }
  0xbc   : > { %332 = vrot.lane.b32.xlu2 %v316_v31, %s1474_s9  ;;  %1343 = vpush %v779_v30 }
  0xbd   : > { %1345 = vpush %v781_v32 }
  0xbe   : > { %v783_v33 = vpop.permute.xlu0 %782  ;;  %v879_v4 = vpop.permute.xlu1 %878 }
  0xbf   : > { %1347 = vpush %v783_v33 }
  0xc0   : > { %s1298_s10 = spop %1297  ;;  %1349 = vpush %v785_v42 }
  0xc1   : > { %v308_v37 = vstv %s1298_s10  ;;  %s1300_s11 = spop %1299  ;;  %1351 = vpush %v875_v53 }
  0xc2   : > { %v318_v38 = vmul.f32 %v308_v37, %v1622_v34  ;;  %v319_v39 = vmul.f32 %v308_v37, %v1625_v35  ;;  %s1632_s13 = spop %1301  ;;  %v311_v45 = vstv %s1300_s11 }
  0xc3   : > { %v314_v41 = vstv %s1632_s13  ;;  %v321_v48 = vmul.f32 %v311_v45, %v1640_v43  ;;  %v320_v49 = vmul.f32 %v311_v45, %v1646_v46 }
  0xc4   : > { %338 = vrot.lane.b32.xlu1 %v319_v39, %s1474_s9  ;;  %336 = vrot.lane.b32.xlu0 %v318_v38, %s1474_s9  ;;  %v322_v47 = vmul.f32 %v314_v41, %v1643_v44  ;;  %v323_v60 = vmul.f32 %v314_v41, %v1673_v58 }
  0xc5   : > { %334 = vrot.lane.b32.xlu2 %v317_v40, %s1474_s9 }
  0xc6   : > { %v877_v52 = vpop.permute.xlu0 %876 }
  0xc7   : > { %1353 = vpush %v877_v52 }
  0xc8   : > { %s1649_s14 = spop %1303  ;;  %1355 = vpush %v879_v4 }
  0xc9   : > { %s1652_s16 = spop %1305  ;;  %v373_v50 = vstv %s1649_s14  ;;  %1357 = vpush %v881_v14 }
  0xca   : > { %v376_v51 = vstv %s1652_s16  ;;  %s1660_s25 = spop %1307  ;;  %v384_v54 = vmul.f32 %v373_v50, %v1616_v28  ;;  %v385_v10 = vmul.f32 %v373_v50, %v1628_v36 }
  0xcb   : > { %v386_v55 = vmul.f32 %v376_v51, %v1622_v34  ;;  %v379_v2 = vstv %s1660_s25  ;;  %v387_v9 = vmul.f32 %v376_v51, %v1625_v35 }
  0xcc   : > { %344 = vrot.lane.b32.xlu1 %v322_v47, %s1474_s9  ;;  %342 = vrot.lane.b32.xlu0 %v321_v48, %s1474_s9  ;;  %v389_v7 = vmul.f32 %v379_v2, %v1640_v43  ;;  %v388_v32 = vmul.f32 %v379_v2, %v1646_v46 }
  0xcd   : > { %340 = vrot.lane.b32.xlu2 %v320_v49, %s1474_s9 }
  0xd0   : > { %s1664_s26 = spop %1309 }
  0xd1   : > { %s1312_s8 = spop %1311  ;;  %v382_v11 = vstv %s1664_s26 }
  0xd2   : > { %v437_v59 = vstv %s1312_s8  ;;  %s1314_s10 = spop %1313  ;;  %v390_v16 = vmul.f32 %v382_v11, %v1643_v44  ;;  %v391_v19 = vmul.f32 %v382_v11, %v1673_v58 }
  0xd3   : > { %v1677_v61 = vmul.f32 %v437_v59, %v1667_v56  ;;  %v440_v62 = vstv %s1314_s10  ;;  %s1316_s11 = spop %1315  ;;  %v1706_v12 = vmul.f32 %v437_v59, %v1628_v36  ;;  %v448_v27 = vmul.f32 %v437_v59, %v1616_v28 }
  0xd4   : > { %404 = vrot.lane.b32.xlu0 %v386_v55, %s1475_s12  ;;  %400 = vrot.lane.b32.xlu1 %v384_v54, %s1475_s12  ;;  %v1682_v63 = vmul.f32 %v440_v62, %v1670_v57  ;;  %v443_v1 = vstv %s1316_s11  ;;  %s1318_s13 = spop %1317  ;;  %v451_v29 = vmul.f32 %v440_v62, %v1622_v34  ;;  %v452_v30 = vmul.f32 %v440_v62, %v1625_v35 }
  0xd5   : > { %346 = vrot.lane.b32.xlu2 %v323_v60, %s1474_s9  ;;  %v1693_v5 = vmul.f32 %v443_v1, %v1685_v0  ;;  %v446_v6 = vstv %s1318_s13  ;;  %s1320_s14 = spop %1319  ;;  %v454_v17 = vmul.f32 %v443_v1, %v1646_v46  ;;  %v455_v18 = vmul.f32 %v443_v1, %v1640_v43 }
  0xd6   : > { %v1697_v8 = vmul.f32 %v446_v6, %v1690_v3  ;;  %v518_v13 = vstv %s1320_s14  ;;  %v458_v20 = vmul.f32 %v446_v6, %v1673_v58  ;;  %v474_v23 = vrot.slane %v1706_v12, 1 }
  0xd7   : > { %v529_v21 = vmul.f32 %v518_v13, %v1616_v28  ;;  %v530_v22 = vmul.f32 %v518_v13, %v1628_v36  ;;  %v476_v24 = vrot.slane %v1677_v61, 1  ;;  %v531_v31 = vmul.f32 %v518_v13, %v1667_v56 }
  0xd8   : > { %s1322_s16 = spop %1321  ;;  %v483_v33 = vrot.slane %v454_v17, 1  ;;  %v484_v37 = vrot.slane %v455_v18, 1  ;;  %v457_v38 = vmul.f32 %v446_v6, %v1643_v44  ;;  %v489_v39 = vrot.slane %v458_v20, 1 }
  0xd9   : > { %v521_v15 = vstv %s1322_s16  ;;  %s1324_s30 = spop %1323  ;;  %v491_v40 = vrot.slane %v1697_v8, 1  ;;  %v553_v41 = vrot.slane %v529_v21, 1  ;;  %v554_v42 = vrot.slane %v530_v22, 1 }
  0xda   : > { %v532_v25 = vmul.f32 %v521_v15, %v1622_v34  ;;  %v1719_v26 = vmul.f32 %v521_v15, %v1625_v35  ;;  %s1725_s25 = spop %1325  ;;  %v524_v48 = vstv %s1324_s30  ;;  %v1739_v49 = vsel %vm472_vm0, %v474_v23, %v476_v24 }
  0xdb   : > { %v473_v50 = vrot.slane %v448_v27, 1  ;;  %v478_v51 = vrot.slane %v451_v29, 1  ;;  %v479_v52 = vrot.slane %v452_v30, 1  ;;  %v556_v53 = vrot.slane %v531_v31, 1 }
  0xdc   : > { %410 = vrot.lane.b32.xlu0 %v389_v7, %s1475_s12  ;;  %406 = vrot.lane.b32.xlu1 %v387_v9, %s1475_s12  ;;  %v558_v45 = vrot.slane %v532_v25, 1  ;;  %v559_v47 = vrot.slane %v1719_v26, 1  ;;  %v481_v54 = vrot.slane %v1682_v63, 1  ;;  %v486_v55 = vrot.slane %v1693_v5, 1 }
  0xdd   : > { %402 = vrot.lane.b32.xlu2 %v385_v10, %s1475_s12  ;;  %v488_v59 = vrot.slane %v457_v38, 1  ;;  %v534_v60 = vmul.f32 %v521_v15, %v1670_v57  ;;  %v536_v61 = vmul.f32 %v524_v48, %v1640_v43  ;;  %v537_v62 = vmul.f32 %v524_v48, %v1685_v0 }
  0xde   : > { %v1751_v1 = vsel %vm472_vm0, %v483_v33, %v484_v37  ;;  %v1754_v2 = vsel %vm472_vm0, %v489_v39, %v491_v40  ;;  %v560_v4 = vsel %vm472_vm0, %v558_v45, %v559_v47  ;;  %v555_v63 = vsel %vm472_vm0, %v553_v41, %v554_v42 }
  0xdf   : > { %v527_v5 = vstv %s1725_s25  ;;  %v557_v6 = vsel %vm472_vm0, %v554_v42, %v556_v53  ;;  %v535_v7 = vmul.f32 %v524_v48, %v1646_v46  ;;  %v1762_v8 = vsel %vm472_vm0, %v478_v51, %v479_v52 }
  0xe0   : > { %s1732_s26 = spop %1327  ;;  %v1765_v9 = vsel %vm472_vm0, %v473_v50, %v474_v23  ;;  %v1768_v10 = vsel %vm472_vm0, %v484_v37, %v486_v55  ;;  %v1771_v11 = vsel %vm472_vm0, %v479_v52, %v481_v54  ;;  %v1774_v12 = vsel %vm472_vm0, %v488_v59, %v489_v39 }
  0xe1   : > { %s1736_s8 = spop %1329  ;;  %v561_v13 = vrot.slane %v534_v60, 1  ;;  %v564_v14 = vrot.slane %v536_v61, 1  ;;  %v566_v15 = vrot.slane %v537_v62, 1  ;;  %v614_v17 = vstv %s1732_s26 }
  0xe2   : > { %s1741_s10 = spop %1331  ;;  %v563_v20 = vrot.slane %v535_v7, 1  ;;  %v539_v23 = vmul.f32 %v527_v5, %v1673_v58  ;;  %v540_v24 = vmul.f32 %v527_v5, %v1690_v3  ;;  %v625_v30 = vmul.f32 %v614_v17, %v1616_v28 }
  0xe3   : > { %v567_v26 = vsel %vm472_vm0, %v564_v14, %v566_v15  ;;  %v562_v27 = vsel %vm472_vm0, %v559_v47, %v561_v13  ;;  %v1789_v31 = vmul.f32 %v614_v17, %v1628_v36  ;;  %v617_v53 = vstv %s1736_s8 }
  0xe4   : > { %414 = vrot.lane.b32.xlu0 %v391_v19, %s1475_s12  ;;  %412 = vrot.lane.b32.xlu1 %v390_v16, %s1475_s12  ;;  %v538_v16 = vmul.f32 %v527_v5, %v1643_v44  ;;  %v565_v38 = vsel %vm472_vm0, %v563_v20, %v564_v14  ;;  %v569_v50 = vrot.slane %v539_v23, 1  ;;  %v571_v51 = vrot.slane %v540_v24, 1 }
  0xe5   : > { %408 = vrot.lane.b32.xlu2 %v388_v32, %s1475_s12  ;;  %v649_v52 = vrot.slane %v625_v30, 1  ;;  %v650_v54 = vrot.slane %v1789_v31, 1  ;;  %v629_v15 = vmul.f32 %v617_v53, %v1625_v35  ;;  %v620_v30 = vstv %s1741_s10 }
  0xe6   : > { %v568_v29 = vrot.slane %v538_v16, 1  ;;  %v572_v14 = vsel %vm472_vm0, %v569_v50, %v571_v51  ;;  %v633_v51 = vmul.f32 %v620_v30, %v1685_v0 }
  0xe7   : > { %v651_v16 = vsel %vm472_vm0, %v649_v52, %v650_v54  ;;  %v655_v31 = vrot.slane %v629_v15, 1 }
  0xe8   : > { %s1748_s11 = spop %1333  ;;  %v570_v13 = vsel %vm472_vm0, %v568_v29, %v569_v50 }
  0xe9   : > { %s1336_s13 = spop %1335 }
  0xea   : > { %s1338_s14 = spop %1337  ;;  %v706_v18 = vstv %s1336_s13 }
  0xeb   : > { %s1340_s16 = spop %1339  ;;  %v709_v19 = vstv %s1338_s14  ;;  %v719_v21 = vmul.f32 %v706_v18, %v1667_v56  ;;  %v717_v32 = vmul.f32 %v706_v18, %v1616_v28  ;;  %v718_v33 = vmul.f32 %v706_v18, %v1628_v36 }
  0xec   : > { %577 = vrot.lane.b32.xlu0 %v560_v4, %s1474_s9  ;;  %573 = vrot.lane.b32.xlu1 %v555_v63, %s1474_s9  ;;  %v712_v22 = vstv %s1340_s16  ;;  %v722_v25 = vmul.f32 %v709_v19, %v1670_v57  ;;  %s1342_s30 = spop %1341  ;;  %v721_v39 = vmul.f32 %v709_v19, %v1625_v35  ;;  %v720_v60 = vmul.f32 %v709_v19, %v1622_v34 }
  0xed   : > { %575 = vrot.lane.b32.xlu2 %v557_v6, %s1474_s9  ;;  %v725_v37 = vmul.f32 %v712_v22, %v1685_v0  ;;  %v723_v40 = vmul.f32 %v712_v22, %v1646_v46  ;;  %v715_v41 = vstv %s1342_s30  ;;  %v724_v42 = vmul.f32 %v712_v22, %v1640_v43  ;;  %s1344_s25 = spop %1343 }
  0xee   : > { %v726_v45 = vmul.f32 %v715_v41, %v1643_v44  ;;  %v727_v47 = vmul.f32 %v715_v41, %v1673_v58  ;;  %v728_v48 = vmul.f32 %v715_v41, %v1690_v3  ;;  %v742_v55 = vrot.slane %v717_v32, 2  ;;  %s1346_s26 = spop %1345 }
  0xef   : > { %v743_v59 = vrot.slane %v718_v33, 2  ;;  %v745_v61 = vrot.slane %v719_v21, 2  ;;  %v748_v62 = vrot.slane %v721_v39, 2  ;;  %v750_v4 = vrot.slane %v722_v25, 2 }
  0xf0   : > { %v752_v63 = vrot.slane %v723_v40, 2  ;;  %v753_v5 = vrot.slane %v724_v42, 2  ;;  %v757_v6 = vrot.slane %v726_v45, 2  ;;  %v758_v7 = vrot.slane %v727_v47, 2  ;;  %s1348_s8 = spop %1347 }
  0xf1   : > { %v630_v18 = vmul.f32 %v617_v53, %v1670_v57  ;;  %v747_v19 = vrot.slane %v720_v60, 2  ;;  %v760_v20 = vrot.slane %v728_v48, 2  ;;  %v628_v21 = vmul.f32 %v617_v53, %v1622_v34  ;;  %s1350_s10 = spop %1349 }
  0xf2   : > { %v755_v22 = vrot.slane %v725_v37, 2  ;;  %v1814_v23 = vsel %vm741_vm1, %v742_v55, %v743_v59  ;;  %v1817_v24 = vsel %vm741_vm1, %v748_v62, %v750_v4  ;;  %v627_v25 = vmul.f32 %v614_v17, %v1667_v56 }
  0xf3   : > { %v1827_v29 = vsel %vm741_vm1, %v752_v63, %v753_v5  ;;  %v657_v32 = vrot.slane %v630_v18, 1  ;;  %v1834_v17 = vsel %vm741_vm1, %v747_v19, %v748_v62  ;;  %v1837_v33 = vsel %vm741_vm1, %v758_v7, %v760_v20 }
  0xf4   : > { %583 = vrot.lane.b32.xlu0 %v567_v26, %s1474_s9  ;;  %579 = vrot.lane.b32.xlu1 %v562_v27, %s1474_s9  ;;  %v1821_v26 = vsel %vm741_vm1, %v757_v6, %v758_v7  ;;  %v1824_v27 = vsel %vm741_vm1, %v743_v59, %v745_v61  ;;  %v654_v37 = vrot.slane %v628_v21, 1  ;;  %v1841_v39 = vsel %vm741_vm1, %v753_v5, %v755_v22 }
  0xf5   : > { %581 = vrot.lane.b32.xlu2 %v565_v38, %s1474_s9  ;;  %v623_v38 = vstv %s1748_s11  ;;  %v652_v40 = vrot.slane %v627_v25, 1  ;;  %v631_v41 = vmul.f32 %v620_v30, %v1646_v46  ;;  %v658_v42 = vsel %vm472_vm0, %v655_v31, %v657_v32  ;;  %s1352_s11 = spop %1351 }
  0xf6   : > { %v632_v45 = vmul.f32 %v620_v30, %v1640_v43  ;;  %v634_v47 = vmul.f32 %v623_v38, %v1643_v44  ;;  %v635_v48 = vmul.f32 %v623_v38, %v1673_v58  ;;  %v656_v50 = vsel %vm472_vm0, %v654_v37, %v655_v31 }
  0xf7   : > { %v653_v52 = vsel %vm472_vm0, %v650_v54, %v652_v40  ;;  %v659_v53 = vrot.slane %v631_v41, 1  ;;  %v662_v61 = vrot.slane %v633_v51, 1  ;;  %v787_v62 = vstv %s1344_s25 }
  0xf8   : > { %v660_v55 = vrot.slane %v632_v45, 1  ;;  %v664_v59 = vrot.slane %v634_v47, 1  ;;  %v665_v60 = vrot.slane %v635_v48, 1  ;;  %v799_v5 = vmul.f32 %v787_v62, %v1628_v36  ;;  %s1354_s13 = spop %1353 }
  0xf9   : > { %v800_v54 = vmul.f32 %v787_v62, %v1667_v56  ;;  %v798_v7 = vmul.f32 %v787_v62, %v1616_v28  ;;  %v793_v19 = vstv %s1348_s8  ;;  %v796_v47 = vstv %s1350_s10  ;;  %s1356_s14 = spop %1355 }
  0xfa   : > { %v666_v4 = vsel %vm472_vm0, %v664_v59, %v665_v60  ;;  %v661_v63 = vsel %vm472_vm0, %v659_v53, %v660_v55  ;;  %v663_v6 = vsel %vm472_vm0, %v660_v55, %v662_v61  ;;  %v804_v30 = vmul.f32 %v793_v19, %v1646_v46 }
  0xfb   : > { %v825_v15 = vrot.slane %v800_v54, 2  ;;  %v822_v18 = vrot.slane %v798_v7, 2  ;;  %v805_v31 = vmul.f32 %v793_v19, %v1640_v43  ;;  %v808_v51 = vmul.f32 %v796_v47, %v1673_v58 }
  0xfc   : > { %669 = vrot.lane.b32.xlu0 %v651_v16, %s1475_s12  ;;  %585 = vrot.lane.b32.xlu1 %v570_v13, %s1474_s9  ;;  %v636_v13 = vmul.f32 %v623_v38, %v1690_v3  ;;  %v790_v16 = vstv %s1346_s26  ;;  %v1476_v59 = vmov 0   ;;  %v807_v61 = vmul.f32 %v796_v47, %v1643_v44  ;;  %s216_s26 = sand.u32 1, %s1464_s19  }
  0xfd   : > { %587 = vrot.lane.b32.xlu2 %v572_v14, %s1474_s9  ;;  %v823_v14 = vrot.slane %v799_v5, 2  ;;  %v801_v21 = vmul.f32 %v790_v16, %v1622_v34  ;;  %v802_v25 = vmul.f32 %v790_v16, %v1625_v35  ;;  %v803_v37 = vmul.f32 %v790_v16, %v1670_v57  ;;  %1403 = vset.pattern.permute.xlu0 %v1476_v59  ;;  %s1276_s8 = sshll.u32 %s216_s26, 6 }
  0xfe   : > { %v667_v20 = vrot.slane %v636_v13, 1  ;;  %v833_v45 = vrot.slane %v805_v31, 2  ;;  %1405 = vset.pattern.permute.xlu2 %v1476_v59  ;;  %1404 = vset.pattern.permute.xlu1 %v1476_v59  ;;  %v806_v62 = vmul.f32 %v793_v19, %v1685_v0  ;;  %v837_v5 = vrot.slane %v807_v61, 2  ;;  %s1972_s10 = scalar_lea.vmem [#allocation2], %s1276_s8 }
  0xff   : > { %v826_v22 = vsel %vm741_vm1, %v823_v14, %v825_v15  ;;  %v824_v32 = vsel %vm741_vm1, %v822_v18, %v823_v14  ;;  %v827_v40 = vrot.slane %v801_v21, 2  ;;  %v828_v41 = vrot.slane %v802_v25, 2 }
 0x100   : > { %v668_v38 = vsel %vm472_vm0, %v665_v60, %v667_v20  ;;  %v830_v48 = vrot.slane %v803_v37, 2  ;;  %v883_v54 = vstv %s1352_s11  ;;  %v835_v7 = vrot.slane %v806_v62, 2  ;;  %s1285_s11 = sshll.u32 %s1530_s22, 6  ;;  %s1133_s22 = scalar_lea.sflag [#allocation3], %s216_s26 }
 0x101   : > { %v829_v55 = vsel %vm741_vm1, %v827_v40, %v828_v41  ;;  %v894_v15 = vmul.f32 %v883_v54, %v1616_v28  ;;  %v895_v16 = vmul.f32 %v883_v54, %v1628_v36  ;;  %v896_v21 = vmul.f32 %v883_v54, %v1667_v56 }
 0x102   : > { %v831_v60 = vsel %vm741_vm1, %v828_v41, %v830_v48 }
 0x103   : > { %v918_v25 = vrot.slane %v894_v15, 2  ;;  %v921_v37 = vrot.slane %v896_v21, 2 }
 0x104   : > { %675 = vrot.lane.b32.xlu0 %v658_v42, %s1475_s12  ;;  %671 = vrot.lane.b32.xlu1 %v653_v52, %s1475_s12  ;;  %v832_v42 = vrot.slane %v804_v30, 2  ;;  %v809_v52 = vmul.f32 %v796_v47, %v1690_v3  ;;  %v919_v30 = vrot.slane %v895_v16, 2 }
 0x105   : > { %673 = vrot.lane.b32.xlu2 %v656_v50, %s1475_s12 }
 0x106   : > { %v834_v53 = vsel %vm741_vm1, %v832_v42, %v833_v45  ;;  %v920_v56 = vsel %vm741_vm1, %v918_v25, %v919_v30  ;;  %v922_v47 = vsel %vm741_vm1, %v919_v30, %v921_v37 }
 0x10c   : > { %681 = vrot.lane.b32.xlu0 %v666_v4, %s1475_s12  ;;  %677 = vrot.lane.b32.xlu1 %v661_v63, %s1475_s12  ;;  %v838_v4 = vrot.slane %v808_v51, 2  ;;  %v840_v63 = vrot.slane %v809_v52, 2  ;;  %v278_v51 = vstv %s1613_s7 }
 0x10d   : > { %679 = vrot.lane.b32.xlu2 %v663_v6, %s1475_s12  ;;  %v886_v6 = vstv %s1354_s13  ;;  %v287_v59 = vmul.f32 %v278_v51, %v1673_v58 }
 0x10e   : > { %v841_v14 = vsel %vm741_vm1, %v838_v4, %v840_v63  ;;  %v897_v18 = vmul.f32 %v886_v6, %v1622_v34  ;;  %v898_v19 = vmul.f32 %v886_v6, %v1625_v35  ;;  %v839_v20 = vsel %vm741_vm1, %v837_v5, %v838_v4 }
 0x10f   : > { %v899_v52 = vmul.f32 %v886_v6, %v1670_v57  ;;  %v266_v63 = vstv %s1602_s17  ;;  %s1153_s17 = sshll.u32 %s1972_s10, 4  ;;  %s2026_s17 = int_to_ptr.vmem [resolvable:$true] %s1153_s17 }
 0x110   : > { %v923_v31 = vrot.slane %v897_v18, 2  ;;  %v281_v15 = vmul.f32 %v266_v63, %v1628_v36  ;;  %v274_v36 = vstv %s1611_s6 }
 0x111   : > { %v926_v61 = vrot.slane %v899_v52, 2  ;;  %v284_v37 = vmul.f32 %v274_v36, %v1646_v46 }
 0x114   : > { %844 = vrot.lane.b32.xlu0 %v826_v22, %s1474_s9  ;;  %683 = vrot.lane.b32.xlu1 %v668_v38, %s1475_s12  ;;  %v836_v22 = vsel %vm741_vm1, %v833_v45, %v835_v7  ;;  %v889_v38 = vstv %s1356_s14 }
 0x115   : > { %842 = vrot.lane.b32.xlu2 %v824_v32, %s1474_s9  ;;  %v924_v32 = vrot.slane %v898_v19, 2  ;;  %v901_v42 = vmul.f32 %v889_v38, %v1640_v43  ;;  %v902_v45 = vmul.f32 %v889_v38, %v1685_v0  ;;  %v900_v48 = vmul.f32 %v889_v38, %v1646_v46  ;;  %v1408_v46 = vld [vmem:[%s2089_s2 + $0x2] ss:$0 sm:$0xff] }
 0x116   : > { %v1875_v50 = vpop.permute.xlu2 %332 }
 0x117   : > { %v925_v41 = vsel %vm741_vm1, %v923_v31, %v924_v32  ;;  %v928_v0 = vrot.slane %v900_v48, 2 }
 0x11c   : > { %850 = vrot.lane.b32.xlu0 %v834_v53, %s1474_s9  ;;  %846 = vrot.lane.b32.xlu1 %v829_v55, %s1474_s9  ;;  %v929_v53 = vrot.slane %v901_v42, 2  ;;  %v931_v55 = vrot.slane %v902_v45, 2 }
 0x11d   : > { %848 = vrot.lane.b32.xlu2 %v831_v60, %s1474_s9 }
 0x11e   : > { %v932_v57 = vsel %vm741_vm1, %v929_v53, %v931_v55  ;;  %v930_v6 = vsel %vm741_vm1, %v928_v0, %v929_v53 }
 0x11f   : > { %v335_v13 = vpop.permute.xlu2 %334 }
 0x120   : > { %v357_v19 = vadd.f32 %v335_v13, %v281_v15  ;;  %v286_v13 = vmul.f32 %v278_v51, %v1643_v44 }
 0x124   : > { %856 = vrot.lane.b32.xlu0 %v841_v14, %s1474_s9  ;;  %852 = vrot.lane.b32.xlu1 %v836_v22, %s1474_s9  ;;  %v927_v14 = vsel %vm741_vm1, %v924_v32, %v926_v61 }
 0x125   : > { %854 = vrot.lane.b32.xlu2 %v839_v20, %s1474_s9  ;;  %s1358_s9 = spop %1357 }
 0x126   : > { %v892_v60 = vstv %s1358_s9  ;;  %s1152_s9 = scalar_lea.hbm %s2090_s3, %s1285_s11 }
 0x127   : > { %v341_v40 = vpop.permute.xlu2 %340  ;;  %v903_v5 = vmul.f32 %v892_v60, %v1643_v44  ;;  %v904_v54 = vmul.f32 %v892_v60, %v1673_v58  ;;  %v905_v7 = vmul.f32 %v892_v60, %v1690_v3  ;;  %v1406_v3 = vld [vmem:[%s2089_s2] ss:$0 sm:$0xff]  ;;  %v280_v44 = vmul.f32 %v266_v63, %v1616_v28  ;;  %s1155_s7 = sshll.u32 %s1152_s9, 4  ;;  %s1156_s7 = int_to_ptr.hbm [resolvable:$true] %s1155_s7 }
 0x128   : > { %v360_v38 = vadd.f32 %v341_v40, %v284_v37  ;;  %s1424_s6 = sshra.s32 %s1156_s7, 4  ;;  %s1425_s6 = int_to_ptr.hbm [resolvable:$true] %s1424_s6 }
 0x129   : > { %v933_v16 = vrot.slane %v903_v5, 2  ;;  %v934_v18 = vrot.slane %v904_v54, 2  ;;  %v936_v20 = vrot.slane %v905_v7, 2  ;;  %v356_v51 = vadd.f32 %v1875_v50, %v280_v44  ;;  %s1426_s16 = scalar_lea.hbm %s1425_s6, 64  ;;  %p1431_p0 = scmp.lt.s32.totalorder %s1425_s6, %s2090_s3 }
 0x12a   : > { %v285_v50 = vmul.f32 %v274_v36, %v1640_v43  ;;  %p1427_p11 = scmp.ne.s32.totalorder %s1425_s6, %s1426_s16 }
 0x12b   : > { %v935_v30 = vsel %vm741_vm1, %v933_v16, %v934_v18  ;;  %v937_v31 = vsel %vm741_vm1, %v934_v18, %v936_v20 }
 0x12c   : > { %942 = vrot.lane.b32.xlu0 %v925_v41, %s1475_s12  ;;  %938 = vrot.lane.b32.xlu1 %v920_v56, %s1475_s12  ;;  %p1428_p12 = pnand %p1427_p11, %p1547_p5 }
 0x12d   : > { %940 = vrot.lane.b32.xlu2 %v922_v47, %s1475_s12  ;;  %v270_v47 = vstv %s1604_s23 }
 0x12e   : > { %v282_v40 = vmul.f32 %v270_v47, %v1622_v34  ;;  %v283_v34 = vmul.f32 %v270_v47, %v1625_v35  ;;  %p1429_p13 = pneg %p1428_p12 }
 0x12f   : > { %v347_v62 = vpop.permute.xlu2 %346 }
 0x130   : > { %v1910_v4 = vadd.f32 %v347_v62, %v287_v59 }
 0x134   : > { %948 = vrot.lane.b32.xlu0 %v932_v57, %s1475_s12  ;;  %944 = vrot.lane.b32.xlu1 %v927_v14, %s1475_s12  ;;  %v1409_v57 = vld [vmem:[%s2089_s2 + $0x3] ss:$0 sm:$0xff] }
 0x135   : > { %946 = vrot.lane.b32.xlu2 %v930_v6, %s1475_s12 }
 0x136   : > { %v339_v58 = vpop.permute.xlu1 %338  ;;  %v337_v21 = vpop.permute.xlu0 %336 }
 0x137   : > { %v403_v22 = vpop.permute.xlu2 %402  ;;  %v358_v53 = vadd.f32 %v337_v21, %v282_v40  ;;  %v359_v63 = vadd.f32 %v339_v58, %v283_v34 }
 0x138   : > { %v425_v25 = vadd.f32 %v403_v22, %v357_v19 }
 0x13a   : > { %v502_v32 = vadd.f32 %v1739_v49, %v425_v25  ;;  %v1407_v49 = vld [vmem:[%s2089_s2 + $0x1] ss:$0 sm:$0xff] }
 0x13c   : > { %979 = vperm.xlu0 %1403, %v1406_v3   ;;  %950 = vrot.lane.b32.xlu1 %v935_v30, %s1475_s12 }
 0x13d   : > { %952 = vrot.lane.b32.xlu2 %v937_v31, %s1475_s12  ;;  %s1430_s12 = scalar_lea.hbm %s2090_s3, 128 }
 0x13e   : > { %v345_v41 = vpop.permute.xlu1 %344  ;;  %v343_v56 = vpop.permute.xlu0 %342  ;;  %p1432_p1 = scmp.lt.s32.totalorder %s1430_s12, %s1426_s16 }
 0x13f   : > { %v362_v42 = vadd.f32 %v345_v41, %v286_v13  ;;  %v409_v45 = vpop.permute.xlu2 %408  ;;  %v361_v5 = vadd.f32 %v343_v56, %v285_v50 }
 0x140   : > { %v428_v48 = vadd.f32 %v409_v45, %v360_v38  ;;  %p1433_p2 = por %p1432_p1, %p1431_p0 }
 0x142   : > { %v505_v52 = vadd.f32 %v1751_v1, %v428_v48  ;;  %p1434_p3 = pnand %p1433_p2, %p1429_p13 }
 0x144   : > { %983 = vperm.xlu1 %1404, %v1407_v49  }
 0x145   : > { %987 = vperm.xlu2 %1405, %v1408_v46  }
 0x146   : > { %v405_v55 = vpop.permute.xlu0 %404  ;;  %v401_v59 = vpop.permute.xlu1 %400 }
 0x147   : > { %v426_v0 = vadd.f32 %v405_v55, %v358_v53  ;;  %v424_v60 = vadd.f32 %v401_v59, %v356_v51  ;;  %v576_v61 = vpop.permute.xlu2 %575 }
 0x148   : > { %v598_v62 = vadd.f32 %v576_v61, %v502_v32 }
 0x149   : > { %v503_v1 = vadd.f32 %v1762_v8, %v426_v0  ;;  %v501_v28 = vadd.f32 %v1765_v9, %v424_v60 }
 0x14c   : > { %991 = vperm.xlu1 %1404, %v1409_v57  }
 0x14e   : > { %v411_v54 = vpop.permute.xlu0 %410  ;;  %v407_v6 = vpop.permute.xlu1 %406 }
 0x14f   : > { %v429_v7 = vadd.f32 %v411_v54, %v361_v5  ;;  %v427_v14 = vadd.f32 %v407_v6, %v359_v63  ;;  %v582_v15 = vpop.permute.xlu2 %581 }
 0x150   : > { %v601_v16 = vadd.f32 %v582_v15, %v505_v52 }
 0x151   : > { %v506_v18 = vadd.f32 %v1768_v10, %v429_v7  ;;  %v504_v19 = vadd.f32 %v1771_v11, %v427_v14 }
 0x156   : > { %v415_v8 = vpop.permute.xlu0 %414  ;;  %v413_v20 = vpop.permute.xlu1 %412 }
 0x157   : > { %v431_v9 = vadd.f32 %v415_v8, %v1910_v4  ;;  %v430_v35 = vadd.f32 %v413_v20, %v362_v42  ;;  %v588_v21 = vpop.permute.xlu2 %587 }
 0x159   : > { %v508_v43 = vadd.f32 %v1754_v2, %v431_v9  ;;  %v507_v58 = vadd.f32 %v1774_v12, %v430_v35 }
 0x15b   : > { %v604_v22 = vadd.f32 %v588_v21, %v508_v43 }
 0x15e   : > { %v578_v25 = vpop.permute.xlu0 %577  ;;  %v574_v3 = vpop.permute.xlu1 %573 }
 0x15f   : > { %v599_v36 = vadd.f32 %v578_v25, %v503_v1  ;;  %v597_v30 = vadd.f32 %v574_v3, %v501_v28  ;;  %v674_v31 = vpop.permute.xlu2 %673 }
 0x161   : > { %v695_v32 = vadd.f32 %v674_v31, %v599_v36 }
 0x163   : > { %v1958_v10 = vadd.f32 %v1834_v17, %v695_v32 }
 0x166   : > { %v584_v11 = vpop.permute.xlu0 %583  ;;  %v580_v37 = vpop.permute.xlu1 %579 }
 0x167   : > { %v602_v13 = vadd.f32 %v584_v11, %v506_v18  ;;  %v600_v4 = vadd.f32 %v580_v37, %v504_v19  ;;  %v680_v38 = vpop.permute.xlu2 %679 }
 0x169   : > { %v698_v41 = vadd.f32 %v680_v38, %v602_v13 }
 0x16b   : > { %v775_v2 = vadd.f32 %v1841_v39, %v698_v41 }
 0x16e   : > { %v670_v56 = vpop.permute.xlu0 %669  ;;  %v586_v12 = vpop.permute.xlu1 %585 }
 0x16f   : > { %v693_v42 = vadd.f32 %v670_v56, %v597_v30  ;;  %v603_v45 = vadd.f32 %v586_v12, %v507_v58  ;;  %v843_v47 = vpop.permute.xlu2 %842 }
 0x171   : > { %v770_v48 = vadd.f32 %v1814_v23, %v693_v42 }
 0x173   : > { %v866_v20 = vadd.f32 %v843_v47, %v770_v48 }
 0x176   : > { %v676_v49 = vpop.permute.xlu0 %675  ;;  %v672_v46 = vpop.permute.xlu1 %671 }
 0x177   : > { %v696_v52 = vadd.f32 %v676_v49, %v600_v4  ;;  %v694_v17 = vadd.f32 %v672_v46, %v598_v62  ;;  %v849_v44 = vpop.permute.xlu2 %848 }
 0x179   : > { %v773_v40 = vadd.f32 %v1817_v24, %v696_v52  ;;  %v771_v51 = vadd.f32 %v1824_v27, %v694_v17 }
 0x17b   : > { %v869_v36 = vadd.f32 %v849_v44, %v773_v40 }
 0x17e   : > { %v682_v53 = vpop.permute.xlu0 %681  ;;  %v678_v55 = vpop.permute.xlu1 %677 }
 0x17f   : > { %v699_v59 = vadd.f32 %v682_v53, %v603_v45  ;;  %v697_v39 = vadd.f32 %v678_v55, %v601_v16  ;;  %v855_v0 = vpop.permute.xlu2 %854 }
 0x181   : > { %v776_v60 = vadd.f32 %v1821_v26, %v699_v59  ;;  %v774_v23 = vadd.f32 %v1827_v29, %v697_v39 }
 0x186   : > { %v845_v61 = vpop.permute.xlu0 %844  ;;  %v684_v57 = vpop.permute.xlu1 %683 }
 0x187   : > { %v700_v1 = vadd.f32 %v684_v57, %v604_v22  ;;  %v941_v62 = vpop.permute.xlu2 %940  ;;  %v867_v19 = vadd.f32 %v845_v61, %v771_v51 }
 0x189   : > { %v777_v28 = vadd.f32 %v1837_v33, %v700_v1  ;;  %v963_v9 = vadd.f32 %v941_v62, %v867_v19 }
 0x18e   : > { %v851_v24 = vpop.permute.xlu0 %850  ;;  %v847_v34 = vpop.permute.xlu1 %846 }
 0x18f   : > { %v947_v27 = vpop.permute.xlu2 %946  ;;  %v870_v54 = vadd.f32 %v851_v24, %v774_v23  ;;  %v868_v30 = vadd.f32 %v847_v34, %v1958_v10  ;;  %v872_v10 = vadd.f32 %v855_v0, %v776_v60 }
 0x191   : > { %v966_v6 = vadd.f32 %v947_v27, %v870_v54 }
 0x196   : > { %v857_v50 = vpop.permute.xlu0 %856  ;;  %v853_v63 = vpop.permute.xlu1 %852 }
 0x197   : > { %v953_v5 = vpop.permute.xlu2 %952  ;;  %v871_v33 = vadd.f32 %v853_v63, %v775_v2  ;;  %v873_v4 = vadd.f32 %v857_v50, %v777_v28 }
 0x199   : > { %v969_v56 = vadd.f32 %v953_v5, %v873_v4 }
 0x19e   : > { %v943_v26 = vpop.permute.xlu0 %942  ;;  %v939_v7 = vpop.permute.xlu1 %938 }
 0x19f   : > { %v988_v29 = vpop.permute.xlu2 %987  ;;  %v962_v35 = vadd.f32 %v939_v7, %v866_v20  ;;  %v964_v31 = vadd.f32 %v943_v26, %v868_v30  ;;  %v1043_v26 = vlaneseq }
 0x1a0   : > { %v1970_v14 = vadd.f32 %v988_v29, %v966_v6 }
 0x1a2   : > { %1007 = vst.msk [vmem:[%s1972_s10 + $0x20] sm:$0xff] %vm1002_vm2, %v1970_v14  ;;  %v1023_v41 = vsel %vm1002_vm2, %v1970_v14, 0.0  ;;  %v1076_v0 = vmul.f32 %v1970_v14, %v1970_v14  ;;  %v2017_v14 = vand.u32 127, %v1043_v26 }
 0x1a4   : > { %v1092_v61 = vsel %vm1002_vm2, %v1076_v0, 0.0 }
 0x1a6   : > { %v949_v15 = vpop.permute.xlu0 %948  ;;  %v945_v16 = vpop.permute.xlu1 %944 }
 0x1a7   : > { %v967_v18 = vadd.f32 %v949_v15, %v871_v33  ;;  %v965_v32 = vadd.f32 %v945_v16, %v869_v36  ;;  %v1046_v15 = vadd.s32 4294967288, %v2017_v14 }
 0x1a9   : > { %v999_v8 = vadd.f32 %v988_v29, %v967_v18 }
 0x1ab   : > { %1008 = vst.msk [vmem:[%s1972_s10 + $0x28] sm:$0xff] %vm1002_vm2, %v999_v8  ;;  %v1026_v46 = vsel %vm1002_vm2, %v999_v8, 0.0  ;;  %v1077_v44 = vmul.f32 %v999_v8, %v999_v8 }
 0x1ad   : > { %v1095_v53 = vsel %vm1002_vm2, %v1077_v44, 0.0 }
 0x1ae   : > { %v980_v21 = vpop.permute.xlu0 %979  ;;  %v951_v43 = vpop.permute.xlu1 %950 }
 0x1af   : > { %v994_v58 = vadd.f32 %v980_v21, %v962_v35  ;;  %v995_v22 = vadd.f32 %v980_v21, %v963_v9  ;;  %v968_v12 = vadd.f32 %v951_v43, %v872_v10 }
 0x1b1   : > { %1003 = vst.msk [vmem:[%s1972_s10] sm:$0xff] %vm1002_vm2, %v994_v58  ;;  %v1014_v25 = vsel %vm1002_vm2, %v995_v22, 0.0  ;;  %v1011_v3 = vsel %vm1002_vm2, %v994_v58, 0.0  ;;  %v1073_v42 = vmul.f32 %v995_v22, %v995_v22  ;;  %v1072_v47 = vmul.f32 %v994_v58, %v994_v58 }
 0x1b2   : > { %1004 = vst.msk [vmem:[%s1972_s10 + $0x8] sm:$0xff] %vm1002_vm2, %v995_v22  ;;  %1015 = vadd.xlane.f32.xlu0 %v1014_v25  ;;  %1012 = vadd.xlane.f32.xlu2 %v1011_v3 }
 0x1b3   : > { %v1083_v52 = vsel %vm1002_vm2, %v1073_v42, 0.0  ;;  %v1080_v17 = vsel %vm1002_vm2, %v1072_v47, 0.0 }
 0x1b6   : > { %v984_v11 = vpop.permute.xlu1 %983 }
 0x1b7   : > { %v996_v37 = vadd.f32 %v984_v11, %v964_v31  ;;  %v997_v13 = vadd.f32 %v984_v11, %v965_v32 }
 0x1b9   : > { %1005 = vst.msk [vmem:[%s1972_s10 + $0x10] sm:$0xff] %vm1002_vm2, %v996_v37  ;;  %v1017_v38 = vsel %vm1002_vm2, %v996_v37, 0.0  ;;  %v1020_v2 = vsel %vm1002_vm2, %v997_v13, 0.0  ;;  %v1075_v40 = vmul.f32 %v997_v13, %v997_v13  ;;  %v1074_v59 = vmul.f32 %v996_v37, %v996_v37 }
 0x1ba   : > { %1006 = vst.msk [vmem:[%s1972_s10 + $0x18] sm:$0xff] %vm1002_vm2, %v997_v13  ;;  %1018 = vadd.xlane.f32.xlu1 %v1017_v38  ;;  %1024 = vadd.xlane.f32.xlu0 %v1023_v41 }
 0x1bb   : > { %1021 = vadd.xlane.f32.xlu2 %v1020_v2  ;;  %v1089_v55 = vsel %vm1002_vm2, %v1075_v40, 0.0  ;;  %v1086_v60 = vsel %vm1002_vm2, %v1074_v59, 0.0 }
 0x1be   : > { %v992_v45 = vpop.permute.xlu1 %991 }
 0x1bf   : > { %v1000_v48 = vadd.f32 %v992_v45, %v968_v12  ;;  %v1001_v49 = vadd.f32 %v992_v45, %v969_v56 }
 0x1c1   : > { %1009 = vst.msk [vmem:[%s1972_s10 + $0x30] sm:$0xff] %vm1002_vm2, %v1000_v48  ;;  %v1029_v51 = vsel %vm1002_vm2, %v1000_v48, 0.0  ;;  %v1078_v39 = vmul.f32 %v1000_v48, %v1000_v48  ;;  %v1079_v57 = vmul.f32 %v1001_v49, %v1001_v49  ;;  %v1032_v62 = vsel %vm1002_vm2, %v1001_v49, 0.0 }
 0x1c2   : > { %1010 = vst.msk [vmem:[%s1972_s10 + $0x38] sm:$0xff] %vm1002_vm2, %v1001_v49  ;;  %1027 = vadd.xlane.f32.xlu1 %v1026_v46  ;;  %1084 = vadd.xlane.f32.xlu0 %v1083_v52 }
 0x1c3   : > { %1081 = vadd.xlane.f32.xlu2 %v1080_v17  ;;  %v1098_v23 = vsel %vm1002_vm2, %v1078_v39, 0.0  ;;  %v1101_v1 = vsel %vm1002_vm2, %v1079_v57, 0.0 }
 0x1ca   : > { %1030 = vadd.xlane.f32.xlu1 %v1029_v51  ;;  %1096 = vadd.xlane.f32.xlu0 %v1095_v53 }
 0x1cb   : > { %1090 = vadd.xlane.f32.xlu2 %v1089_v55 }
 0x1d2   : > { %1087 = vadd.xlane.f32.xlu1 %v1086_v60  ;;  %1099 = vadd.xlane.f32.xlu0 %v1098_v23 }
 0x1d3   : > { %1093 = vadd.xlane.f32.xlu2 %v1092_v61 }
 0x1da   : > { %1102 = vadd.xlane.f32.xlu1 %v1101_v1 }
 0x1db   : > { %1033 = vadd.xlane.f32.xlu2 %v1032_v62 }
 0x225   : > { %v2011_v28 = vpop.xlane.xlu0 %1015  ;;  %v2013_v24 = vpop.xlane.xlu2 %1012 }
 0x22d   : > { %v1019_v34 = vpop.xlane.xlu1 %1018  ;;  %v1025_v27 = vpop.xlane.xlu0 %1024 }
 0x22e   : > { %v1022_v50 = vpop.xlane.xlu2 %1021  ;;  %v1050_v9 = vperm.slane %v1019_v34, %v2017_v14 }
 0x22f   : > { %v1051_v35 = vperm.slane %v1022_v50, %v1046_v15 }
 0x235   : > { %v1028_v63 = vpop.xlane.xlu1 %1027  ;;  %v1085_v54 = vpop.xlane.xlu0 %1084 }
 0x236   : > { %v1082_v5 = vpop.xlane.xlu2 %1081  ;;  %v1113_v19 = vperm.slane %v1085_v54, %v1046_v15  ;;  %v1054_v43 = vperm.slane %v1028_v63, %v1046_v15 }
 0x237   : > { %v1112_v8 = vperm.slane %v1082_v5, %v2017_v14 }
 0x23d   : > { %v2015_v6 = vpop.xlane.xlu1 %1030  ;;  %v1097_v29 = vpop.xlane.xlu0 %1096 }
 0x23e   : > { %v1091_v7 = vpop.xlane.xlu2 %1090 }
 0x23f   : > { %v1116_v20 = vperm.slane %v1091_v7, %v1046_v15 }
 0x245   : > { %v1088_v33 = vpop.xlane.xlu1 %1087 }
 0x246   : > { %v1115_v16 = vperm.slane %v1088_v33, %v2017_v14  ;;  %v1094_v18 = vpop.xlane.xlu2 %1093 }
 0x247   : > { %v1118_v21 = vperm.slane %v1094_v18, %v2017_v14 }
 0x248   : > { %v1117_v58 = vsel %vm1048_vm3, %v1116_v20, %v1115_v16 }
 0x249   : > { %1437 = shalt.err (!%p1434_p3)
}
 0x24a   : > { %s1477_s26 = smov 128   ;;  %s1478_s10 = smov 8   ;;  %v1047_v22 = vperm.slane %v2011_v28, %v1046_v15  ;;  %v1045_v25 = vperm.slane %v2013_v24, %v2017_v14  ;;  %v1119_v3 = vperm.slane %v1097_v29, %v1046_v15  ;;  %v1100_v36 = vpop.xlane.xlu0 %1099  ;;  %v1053_v30 = vperm.slane %v1025_v27, %v2017_v14 }
 0x24b   : > { %1359 = dma.vmem_to_hbm [thread:$0]  (%p1547_p5), %s2026_s17, 1024, %s1156_s7, %s1133_s22, %s1477_s26, %s1477_s26, %s1478_s10   ;;  %v1114_v31 = vsel %vm1048_vm3, %v1113_v19, %v1112_v8  ;;  %vm1059_vm4 = vcmask 1041409   ;;  %v1052_v32 = vsel %vm1048_vm3, %v1051_v35, %v1050_v9  ;;  %vm1061_vm5 = vcmask 1042434  }
 0x24c   : > { %v1120_v11 = vsel %vm1048_vm3, %v1119_v3, %v1118_v21  ;;  %v1124_v13 = vsel %vm1059_vm4, %v1117_v58, %v1114_v31  ;;  %v1055_v4 = vsel %vm1048_vm3, %v1054_v43, %v1053_v30  ;;  %v1121_v38 = vperm.slane %v1100_v36, %v2017_v14  ;;  %s1278_s28 = sshll.u32 %s1599_s15, 2 }
 0x24d   : > { %v1103_v37 = vpop.xlane.xlu1 %1102  ;;  %vm1063_vm6 = vcmask 1043459   ;;  %v1049_v10 = vsel %vm1048_vm3, %v1047_v22, %v1045_v25  ;;  %v1056_v56 = vperm.slane %v2015_v6, %v2017_v14  ;;  %vm1066_vm7 = vcmask 125952   ;;  %s243_s14 = scalar_lea.vmem %s2092_s5, %s1278_s28  ;;  %s239_s7 = scalar_lea.vmem %s2091_s4, %s1278_s28 }
 0x24e   : > { %v1122_v41 = vperm.slane %v1103_v37, %v1046_v15  ;;  %v1034_v2 = vpop.xlane.xlu2 %1033  ;;  %v1125_v45 = vsel %vm1061_vm5, %v1120_v11, %v1124_v13  ;;  %v1060_v47 = vsel %vm1059_vm4, %v1052_v32, %v1049_v10  ;;  %vm1070_vm8 = vcmask 3072  }
 0x24f   : > { %v1057_v12 = vperm.slane %v1034_v2, %v1046_v15  ;;  %v1062_v46 = vsel %vm1061_vm5, %v1055_v4, %v1060_v47 }
 0x250   : > { %v1123_v42 = vsel %vm1048_vm3, %v1122_v41, %v1121_v38 }
 0x251   : > { %v1126_v48 = vsel %vm1063_vm6, %v1123_v42, %v1125_v45  ;;  %v1058_v49 = vsel %vm1048_vm3, %v1057_v12, %v1056_v56 }
 0x252   : > { %v1128_v52 = vsel %vm1066_vm7, %v1126_v48, 0.0  ;;  %v1064_v17 = vsel %vm1063_vm6, %v1058_v49, %v1062_v46 }
 0x253   : > { %1129 = vadd.xlane.f32.xlu0 %v1128_v52  ;;  %v1067_v44 = vsel %vm1066_vm7, %v1064_v17, 0.0 }
 0x254   : > { %1068 = vadd.xlane.f32.xlu2 %v1067_v44 }
 0x2c6   : > { %v1130_v40 = vpop.xlane.xlu0 %1129 }
 0x2c7   : > { %1131 = vst.msk [vmem:[%s243_s14] sm:$0xf] %vm1070_vm8, %v1130_v40  ;;  %v1069_v51 = vpop.xlane.xlu2 %1068 }
 0x2c8   : > { %1071 = vst.msk [vmem:[%s239_s7] sm:$0xf] %vm1070_vm8, %v1069_v51 }
 0x2c9 PF: > { %p1365_p4 = scmp.ge.s32.totalorder %s1472_s21, 2  ;;  %s1176_s22 = sand.u32 1, %s1460_s18  }
 0x2ca   : > { %s1177_s15 = scalar_lea.sflag [#allocation3], %s1176_s22 }
 0x2cb   : > { %p1362_p5 = pnand %p1365_p4, %p1551_p6 }
 0x2cd   : > { %p1363_p7 = pneg %p1362_p5 }
 0x2cf   : > { %1455 = dma.done.wait (%p1363_p7), %s1177_s15, 1024  }
 0x2d0   : > { %1457 = vsyncadd (%p1363_p7), %s1177_s15, 4294966272  ;;  %p16_p8 = scmp.ge.s32.totalorder %s1534_s24, 4   ;;  %s2095_s18 = smov %s1464_s19 }
 0x2d1   : > { %s2096_s19 = smov %s1468_s20  ;;  %s2097_s20 = smov %s1545_s27 }
 0x2d2   : > { %s2098_s21 = smov %s1534_s24  ;;  %18 = sbr.rel (!%p16_p8) target bundleno = 3 (0x3), region = 91 }
 0x2d7   :  { %1197 = vsyncpa [#allocation3], 1 }
 0x2d8   :  { %1199 = vsyncpa [#allocation3 + $0x1], 1 }

</bundles_post_ra>
